<compile_context>
chip_gen: v5e
topology: v5e:2x2
jax: 0.10.0
libtpu: 0.0.40
codegen_flags: <defaults>
</compile_context>

<pallas_src>
import jax
import jax.numpy as jnp
from jax.experimental import pallas as pl
from jax.experimental.pallas import tpu as pltpu

_LANES = 128


def _make_pool_kernel(lb):
    """Build the pooling kernel body for a static layer-block size `lb`."""
    if lb == 1:
        def kernel(w_ref, x_ref, o_ref):
            # w_ref: SMEM (n_pool,) pre-normalized weights.
            # x_ref: VMEM (tile_r, 128) one layer's tile (leading dim squeezed).
            # o_ref: VMEM (tile_r, 128) accumulator resident across layer axis.
            l = pl.program_id(1)
            contrib = w_ref[l] * x_ref[...].astype(jnp.float32)

            @pl.when(l == 0)
            def _():
                o_ref[...] = contrib          # first layer: store directly

            @pl.when(l != 0)
            def _():
                o_ref[...] += contrib         # remaining layers: accumulate

        return kernel

    def kernel(w_ref, x_ref, o_ref):
        # x_ref: VMEM (lb, tile_r, 128) -- `lb` layers per grid step.
        l = pl.program_id(1)
        contrib = w_ref[l * lb] * x_ref[0].astype(jnp.float32)
        for j in range(1, lb):                # tiny unrolled in-kernel sum
            contrib += w_ref[l * lb + j] * x_ref[j].astype(jnp.float32)

        @pl.when(l == 0)
        def _():
            o_ref[...] = contrib

        @pl.when(l != 0)
        def _():
            o_ref[...] += contrib

    return kernel


def _hw_config():
    """Return (bytes_target_per_step, vmem_limit_bytes, multi_tensorcore)."""
    try:
        info = pltpu.get_tpu_info()
        vmem_cap = int(getattr(info, "vmem_capacity_bytes", 128 * 1024 * 1024))
        version = str(getattr(info, "chip_version", "")).lower()
    except Exception:
        # Could not query the chip: conservative settings valid on every gen.
        return 4 * 1024 * 1024, 32 * 1024 * 1024, False

    if vmem_cap <= 64 * 1024 * 1024:
        # v7x-like: 64 MiB physical VMEM, 2 TensorCores/chip.
        # VMEM cost ~= 2x input buffers + 2x output buffers ~= 4x tile.
        return 4 * 1024 * 1024, 30 * 1024 * 1024, True
    if "5" in version:
        # v5e: ~0.82 TB/s HBM -> 4 MiB tiles already amortize step overhead;
        # explicit vmem_limit needed (scoped default is only 16 MiB).
        return 4 * 1024 * 1024, 32 * 1024 * 1024, False
    # v6e (or other 128 MiB-VMEM part): bigger tiles, bigger scoped budget.
    return 8 * 1024 * 1024, 80 * 1024 * 1024, False


def _choose_tile_rows(rows, lb, itemsize, bytes_target, multi_tc):
    """Rows per tile so the per-step *input* slab is ~bytes_target."""
    pack = max(8, (8 * 4) // itemsize)        # sublane packing: 8 f32 / 16 bf16 / 32 i8
    t = bytes_target // (lb * _LANES * itemsize)
    t = max(pack, (t // pack) * pack)
    if t >= rows:
        t = rows                               # full extent (always legal)
    if multi_tc and t == rows and rows > pack:
        # Force >= 2 row tiles so both TensorCores get work on the parallel axis.
        half = (rows + 1) // 2
        t = max(pack, ((half + pack - 1) // pack) * pack)
        if t >= rows:
            t = max(pack, ((rows // 2) // pack) * pack)
    return t


def weighted_layer_pooling(all_hidden_states, layer_weights, layer_start=4):
    """all_hidden_states: (L_total, B, S, H) f32/bf16; layer_weights: (L_total-layer_start,)."""
    l_total, b, s, h = all_hidden_states.shape
    n_pool = l_total - layer_start
    assert layer_weights.shape == (n_pool,)

    # Pre-normalize weights (tiny (n_pool,) op) -> no per-element divide in kernel.
    w_norm = (layer_weights / jnp.sum(layer_weights)).astype(jnp.float32)

    # Lane-dense 2D layout: flatten (B,S,H), pad to a multiple of 128 so every
    # output store is an unmasked full-lane vst (pad is sliced off after).
    n = b * s * h
    n_pad = ((n + _LANES - 1) // _LANES) * _LANES
    x = all_hidden_states.reshape(l_total, n)
    if n_pad != n:
        x = jnp.pad(x, ((0, 0), (0, n_pad - n)))
    rows = n_pad // _LANES
    x2d = x.reshape(l_total, rows, _LANES)

    bytes_target, vmem_limit, multi_tc = _hw_config()
    itemsize = jnp.dtype(all_hidden_states.dtype).itemsize

    # Layer blocking: amortize per-grid-step overhead when divisibility allows
    # (requires layer_start % lb == 0 and n_pool % lb == 0 so every block is
    # aligned and fully in-bounds). Default BERT config (n_pool=9) -> lb=1.
    lb = 1
    for cand in (8, 4, 2):
        if n_pool % cand == 0 and layer_start % cand == 0:
            lb = cand
            break

    tile_r = _choose_tile_rows(rows, lb, itemsize, bytes_target, multi_tc)
    n_row_tiles = pl.cdiv(rows, tile_r)
    n_layer_steps = n_pool // lb

    if lb == 1:
        in_spec = pl.BlockSpec(
            (pl.Squeezed(), tile_r, _LANES),
            lambda r, l, w: (layer_start + l, r, 0),
        )
    else:
        layer_block0 = layer_start // lb
        in_spec = pl.BlockSpec(
            (lb, tile_r, _LANES),
            lambda r, l, w: (layer_block0 + l, r, 0),
        )

    out2d = pl.pallas_call(
        _make_pool_kernel(lb),
        out_shape=jax.ShapeDtypeStruct((rows, _LANES), jnp.float32),
        grid_spec=pltpu.PrefetchScalarGridSpec(
            num_scalar_prefetch=1,                 # layer_weights -> SMEM
            grid=(n_row_tiles, n_layer_steps),     # reduction (layer) axis LAST
            in_specs=[in_spec],
            out_specs=pl.BlockSpec((tile_r, _LANES), lambda r, l, w: (r, 0)),
        ),
        compiler_params=pltpu.CompilerParams(
            dimension_semantics=("parallel", "arbitrary"),
            vmem_limit_bytes=vmem_limit,
        ),
    )(w_norm, x2d)

    out = out2d.reshape(n_pad)
    if n_pad != n:
        out = out[:n]
    return out.reshape(b, s, h)


def reference(all_hidden_states, layer_weights, layer_start=4):
    x = all_hidden_states[layer_start:].astype(jnp.float32)
    w = layer_weights.reshape(-1, 1, 1, 1)
    return (w * x).sum(axis=0) / layer_weights.sum()


if __name__ == "__main__":
    num_hidden_layers = 12
    layer_start = 4
    batch, seq, hidden = 2, 8, 32

    key = jax.random.PRNGKey(0)
    k1, _ = jax.random.split(key)
    all_hidden_states = jax.random.normal(
        k1, (num_hidden_layers + 1, batch, seq, hidden), dtype=jnp.float32
    )
    # Deterministic parameter init (matches nn.Parameter(torch.tensor([1]*N, float)))
    layer_weights = jnp.ones((num_hidden_layers + 1 - layer_start,), dtype=jnp.float32)

    out = weighted_layer_pooling(all_hidden_states, layer_weights, layer_start)
    out = jax.block_until_ready(out)

    ref = reference(all_hidden_states, layer_weights, layer_start)
    assert out.shape == (batch, seq, hidden)
    assert jnp.allclose(out, ref, atol=1e-5, rtol=1e-5), "mismatch vs reference"

    print("KERNEL_OK")
</pallas_src>

<mosaic_0001>
module attributes {stable_mosaic.version = 11 : i64} {
  func.func @kernel(%arg0: i32, %arg1: i32, %arg2: memref<9xf32, #tpu.memory_space<smem>>, %arg3: memref<1x4x128xf32, #tpu.memory_space<vmem>>, %arg4: memref<4x128xf32, #tpu.memory_space<vmem>>) attributes {dimension_semantics = [#tpu.dimension_semantics<parallel>, #tpu.dimension_semantics<arbitrary>], iteration_bounds = array<i64: 1, 9>, scalar_prefetch = 1 : i64, scratch_operands = 0 : i64, tpu.core_type = #tpu.core_type<tc>, window_params = [{transform_indices = @transform_0, window_bounds = array<i64: 1, 4, 128>}, {transform_indices = @transform_1, window_bounds = array<i64: 4, 128>}]} {
    %0 = arith.index_cast %arg1 : i32 to index
    %1 = memref.load %arg2[%0] : memref<9xf32, #tpu.memory_space<smem>>
    %c0 = arith.constant 0 : index
    %c0_0 = arith.constant 0 : index
    %c0_1 = arith.constant 0 : index
    %2 = vector.load %arg3[%c0, %c0_0, %c0_1] : memref<1x4x128xf32, #tpu.memory_space<vmem>>, vector<1x4x128xf32>
    %3 = vector.shape_cast %2 : vector<1x4x128xf32> to vector<4x128xf32>
    %4 = vector.broadcast %1 : f32 to vector<4x128xf32>
    %5 = arith.mulf %4, %3 : vector<4x128xf32>
    %c0_i32 = arith.constant 0 : i32
    %6 = arith.cmpi eq, %arg1, %c0_i32 : i32
    %7 = arith.extui %6 : i1 to i32
    %c0_i32_2 = arith.constant 0 : i32
    %8 = arith.cmpi ne, %7, %c0_i32_2 : i32
    scf.if %8 {
      %c0_5 = arith.constant 0 : index
      %c0_6 = arith.constant 0 : index
      %12 = vector.load %arg4[%c0_5, %c0_6] : memref<4x128xf32, #tpu.memory_space<vmem>>, vector<4x128xf32>
      tpu.vector_store %arg4[%c0_5, %c0_6], %5 {strides = array<i32>} : memref<4x128xf32, #tpu.memory_space<vmem>>, vector<4x128xf32>,
    } else {
    }
    %c0_i32_3 = arith.constant 0 : i32
    %9 = arith.cmpi ne, %arg1, %c0_i32_3 : i32
    %10 = arith.extui %9 : i1 to i32
    %c0_i32_4 = arith.constant 0 : i32
    %11 = arith.cmpi ne, %10, %c0_i32_4 : i32
    scf.if %11 {
      %c0_5 = arith.constant 0 : index
      %c0_6 = arith.constant 0 : index
      %12 = vector.load %arg4[%c0_5, %c0_6] : memref<4x128xf32, #tpu.memory_space<vmem>>, vector<4x128xf32>
      %13 = arith.addf %12, %5 : vector<4x128xf32>
      %c0_7 = arith.constant 0 : index
      %c0_8 = arith.constant 0 : index
      %14 = vector.load %arg4[%c0_7, %c0_8] : memref<4x128xf32, #tpu.memory_space<vmem>>, vector<4x128xf32>
      tpu.vector_store %arg4[%c0_7, %c0_8], %13 {strides = array<i32>} : memref<4x128xf32, #tpu.memory_space<vmem>>, vector<4x128xf32>,
    } else {
    }
    return
  }
  func.func @transform_0(%arg0: i32, %arg1: i32, %arg2: memref<9xf32, #tpu.memory_space<smem>>) -> (i32, i32, i32) {
    %c4_i32 = arith.constant 4 : i32
    %0 = arith.addi %c4_i32, %arg1 : i32
    %c0_i32 = arith.constant 0 : i32
    %c0_i32_0 = arith.constant 0 : i32
    return %0, %arg0, %c0_i32 : i32, i32, i32
  }
  func.func @transform_1(%arg0: i32, %arg1: i32, %arg2: memref<9xf32, #tpu.memory_space<smem>>) -> (i32, i32) {
    %c0_i32 = arith.constant 0 : i32
    %c0_i32_0 = arith.constant 0 : i32
    return %arg0, %c0_i32 : i32, i32
  }
}

</mosaic_0001>

<bundles_post_ra>
// kernel: tpu_custom_call.1
= control target key start
LH: loop header
LB: loop body
LE: loop exit
PB: predicated region body
PF: predicated region fallthrough
CT: control target
= control target key end

     0   :  { %s449_s12 = smov [#allocation3]   ;;  %s562_s0 = inlined_call_operand.hbm [shape: f32[9], index: 0, kind: input, shape index: {}]   ;;  %s563_s1 = inlined_call_operand.hbm [shape: f32[13,4,128], index: 1, kind: input, shape index: {}]   ;;  %s564_s2 = inlined_call_operand.hbm [shape: f32[4,128], index: 2, kind: output, shape index: {}]  }
   0x1   :  { %s8_s11 = sshll.u32 %s562_s0, 4  ;;  %s9_s11 = int_to_ptr.hbm [resolvable:$true] %s8_s11 }
   0x2   :  { %11 = dma.hbm_to_smem %s9_s11, 16, %s449_s12, [#allocation2] }
   0x3   :  { %415 = dma.done.wait [#allocation2], 16 }
   0x4   :  { %416 = vsyncadd [#allocation2], 4294967280 }
   0x5   :  { %14 = sfence }
   0x6   :  { %15 = vsyncpa [#allocation5], 0 }
   0x7   :  { %17 = vsyncpa [#allocation5 + $0x1], 0 }
   0x8   :  { %18 = vsyncpa [#allocation6], 0  ;;  %s469_s13 = smov 0   ;;  %s471_s14 = smov 0  }
   0x9   :  { %s473_s15 = smov 0   ;;  %s475_s16 = smov 0  }
   0xa   :  { %s477_s17 = smov 0   ;;  %s479_s0 = smov 0  }
   0xb LB: > { %s245_s18 = sadd.s32 4294967295, %s447_s0   ;;  %s33_s19 = sadd.s32 1, %s443_s17  ;;  %s447_s0 = sphi %s479_s0, %s24_s0   ;;  %s443_s17 = sphi %s477_s17, %s571_s17   ;;  %s439_s16 = sphi %s475_s16, %s570_s16   ;;  %s435_s15 = sphi %s473_s15, %s569_s15   ;;  %s431_s14 = sphi %s471_s14, %s568_s14   ;;  %s427_s13 = sphi %s469_s13, %s567_s13  }
   0xc   : > { %p34_p0 = scmp.ge.s32.totalorder %s33_s19, 9  ;;  %s40_s20 = sadd.s32 4, %s443_s17 }
   0xd   : > { %s47_s21 = sadd.s32 1, %s435_s15  ;;  %p54_p1 = scmp.ne.s32.totalorder %s435_s15, %s431_s14 }
   0xe   : > { %s573_s19 = smov (%p34_p0, %s33_s19), 0  ;;  %p55_p2 = scmp.eq.s32.totalorder %s447_s0, 0 }
   0xf   : > { %p60_p3 = scmp.ne.s32.totalorder %s431_s14, %s427_s13  ;;  %s41_s22 = sadd.s32 4, %s573_s19 }
  0x10   : > { %p61_p4 = scmp.eq.s32.totalorder %s245_s18, 0  ;;  %s42_s23 = ssub.s32 %s40_s20, %s41_s22 }
  0x11   : > { %p510_p5 = por %p55_p2, %p54_p1  ;;  %p45_p6 = scmp.eq.s32.totalorder %s42_s23, 0 }
  0x12   : > { %p514_p7 = por %p61_p4, %p60_p3  ;;  %p268_p8 = scmp.lt.s32.totalorder %s447_s0, 9 }
  0x13   : > { %s520_s26 = scalar_select %p45_p6, %s435_s15, %s47_s21  }
  0x14   : > { %s110_s27 = sand.u32 1, %s435_s15   ;;  %s249_s28 = sshll.u32 %s443_s17, 2 }
  0x15   : > { %s248_s29 = sshll.u32 %s110_s27, 2  ;;  %s206_s4 = scalar_lea.hbm %s563_s1, %s249_s28 }
  0x16   : > { %s207_s5 = scalar_lea.hbm %s206_s4, 16  ;;  %s114_s6 = scalar_lea.vmem [#allocation4], %s248_s29 }
  0x17   : > { %s124_s7 = sshll.u32 %s114_s6, 4  ;;  %s122_s8 = sshll.u32 %s207_s5, 4  ;;  %s125_s7 = int_to_ptr.vmem [resolvable:$true] %s124_s7  ;;  %s123_s8 = int_to_ptr.hbm [resolvable:$true] %s122_s8 }
  0x18   : > { %p265_p9 = pnand %p268_p8, %p510_p5  ;;  %p250_p10 = scmp.ge.s32.totalorder %s447_s0, 1 }
  0x19   : > { %p129_p11 = scmp.lt.s32.totalorder %s447_s0, 10  ;;  %s111_s9 = scalar_lea.sflag [#allocation5], %s110_s27 }
  0x1a   : > { %267 = dma.hbm_to_vmem [thread:$0]  (!%p265_p9), %s123_s8, 64, %s125_s7, %s111_s9  }
  0x1b   : > { %p130_p12 = pnand %p250_p10, %p129_p11 }
  0x1c   : > { %s135_s10 = sand.u32 (!%p130_p12), 1, %s431_s14  }
  0x1d   : > { %133 = sbr.rel (%p130_p12) target bundleno = 62 (0x3e), region = 24  ;;  %s251_s11 = sshll.u32 (!%p130_p12), %s135_s10, 2 }
  0x1e   : > { %s136_s12 = scalar_lea.sflag (!%p130_p12), [#allocation5], %s135_s10  ;;  %s139_s13 = scalar_lea.vmem (!%p130_p12), [#allocation4], %s251_s11 }
  0x22   : > { %418 = dma.done.wait (%p514_p7), %s136_s12, 64  }
  0x23   : > { %420 = vsyncadd (%p514_p7), %s136_s12, 4294967232  ;;  %s155_s20 = sld [smem:[#allocation3 + %s439_s16]]  ;;  %v156_v0 = vld [vmem:[%s139_s13] sm:$0xf]  ;;  %p252_p13 = scmp.ne.s32.totalorder %s439_s16, 0 }
  0x26   : > { %162 = sbr.rel (%p252_p13) target bundleno = 45 (0x2d), region = 32 }
  0x29   : > { %v157_v1 = vstv %s155_s20 }
  0x2a   : > { %v158_v2 = vmul.f32 %v157_v1, %v156_v0 }
  0x2c   : > { %163 = vst [vmem:[#allocation7] sm:$0xf] %v158_v2 }
  0x2d PF: > { %p253_p0 = scmp.eq.s32.totalorder %s439_s16, 0 }
  0x2f   : > { %167 = sbr.rel (%p253_p0) target bundleno = 56 (0x38), region = 36 }
  0x34   : > { %v168_v3 = vld [vmem:[#allocation7] sm:$0xf] }
  0x35   : > { %v169_v4 = vadd.f32 %v168_v3, %v158_v2 }
  0x37   : > { %170 = vst [vmem:[#allocation7] sm:$0xf] %v169_v4 }
  0x38 PF: > { %p269_p1 = scmp.eq.s32.totalorder %s245_s18, 8  ;;  %s181_s23 = sshll.u32 %s564_s2, 4  ;;  %s182_s23 = int_to_ptr.hbm [resolvable:$true] %s181_s23 }
  0x39   : > { %s450_s24 = smov [#allocation7]  }
  0x3a   : > { %s179_s25 = sshll.u32 %s450_s24, 4  ;;  %s180_s25 = int_to_ptr.vmem [resolvable:$true] %s179_s25 }
  0x3b   : > { %261 = dma.vmem_to_hbm [thread:$0]  (%p269_p1), %s180_s25, 64, %s182_s23, [#allocation6]  }
  0x3c   : > { %422 = dma.done.wait (%p269_p1), [#allocation6], 64  }
  0x3d   : > { %424 = vsyncadd (%p269_p1), [#allocation6], 4294967232 }
  0x3e PF: > { %s24_s0 = sadd.s32 1, %s447_s0   ;;  %s567_s13 = smov %s431_s14 }
  0x3f   : > { %p21_p2 = scmp.ge.s32.totalorder %s24_s0, 11   ;;  %s568_s14 = smov %s435_s15 }
  0x40   : > { %s569_s15 = smov %s520_s26  ;;  %s570_s16 = smov %s443_s17 }
  0x41   : > { %s571_s17 = smov %s573_s19  ;;  %23 = sbr.rel (!%p21_p2) target bundleno = 11 (0xb), region = 70 }
  0x46   :  { %195 = vsyncpa [#allocation5], 1 }
  0x47   :  { %197 = vsyncpa [#allocation5 + $0x1], 1 }
  0x48   :  { %198 = vsyncpa [#allocation6], 1 }
  0x49   :  { %200 = vsyncpa [#allocation6 + $0x1], 1 }

</bundles_post_ra>
